<compile_context>
chip_gen: v7x
topology: tpu7x:2x2x1
jax: 0.10.0
libtpu: 0.0.40
codegen_flags: <defaults>
</compile_context>

<pallas_src>
import functools

import numpy as np
import jax
import jax.numpy as jnp
from jax.experimental import pallas as pl
from jax.experimental.pallas import tpu as pltpu

EMB_DIM = 32
HEADS = 4
D = EMB_DIM * HEADS            # 128
SQRT_EMB = float(EMB_DIM) ** 0.5


def _round_up(x, m):
    return ((x + m - 1) // m) * m


@functools.lru_cache(maxsize=None)
def _head_masks(dtype_name):
    """(D, H) block-diagonal 0/1 head mask and its transpose (exact in bf16)."""
    head = np.arange(D) // EMB_DIM
    m = (head[:, None] == np.arange(HEADS)[None, :]).astype(np.float32)      # (D, H)
    dt = jnp.dtype(dtype_name)
    return (jnp.asarray(m, dtype=dt),
            jnp.asarray(np.ascontiguousarray(m.T), dtype=dt))                # (D,H), (H,D)


@functools.lru_cache(maxsize=None)
def _segment_matrices(tb, ne, dtype_name):
    """0/1 matrices mapping batch rows <-> (batch, entity) rows within a tile."""
    rep = (np.arange(tb * ne)[:, None] // ne == np.arange(tb)[None, :]).astype(np.float32)
    dt = jnp.dtype(dtype_name)
    return (jnp.asarray(rep, dtype=dt),
            jnp.asarray(np.ascontiguousarray(rep.T), dtype=dt))              # (TB*ne,TB), (TB,TB*ne)


def _asn_attention_kernel(xk_ref, xq_ref, wq_ref, wkv_ref, bq_ref, bkv_ref,
                          msk_ref, mskt_ref, rep_ref, rept_ref, o_ref):
    # xk_ref : (TB*ne, D)   flattened entity features of this batch tile (k/v input)
    # xq_ref : (TB, D)      first-entity features (q input)
    # wq_ref : (D, D)       wkv_ref: (D, 2D)  fused Wk|Wv
    # bq_ref : (1, D)       bkv_ref: (1, 2D)  fused bk|bv   (f32)
    # msk_ref: (D, H)       0/1 block-diag head mask        mskt_ref: (H, D) transpose
    # rep_ref: (TB*ne, TB)  0/1 "repeat per batch element"  rept_ref: (TB, TB*ne) "sum"
    # o_ref  : (TB, D)
    f32 = jnp.float32
    cdt = xk_ref.dtype          # compute dtype (bf16 or f32); accumulation stays f32

    # Projections (MXU, f32 accumulation).  q only from the first entity of every
    # batch element; k/v fused into one 256-wide RHS matmul.  1/sqrt(emb_dim) is
    # folded into q so the (exact-in-bf16) 0/1 head masks stay unscaled.
    q = (jnp.dot(xq_ref[...], wq_ref[...], preferred_element_type=f32)
         + bq_ref[...]) * (1.0 / SQRT_EMB)                                          # (TB, D)
    kv = (jnp.dot(xk_ref[...], wkv_ref[...], preferred_element_type=f32)
          + bkv_ref[...])                                                           # (TB*ne, 2D)
    k = kv[:, :D]
    v = kv[:, D:]

    # Broadcast each query to its ne entity rows via the 0/1 repeat matrix.  All
    # secondary matmul operands are cast to the compute dtype so every MXU op runs
    # at full bf16 rate on the bf16 path (no-op casts on the f32 path).
    q_rows = jnp.dot(rep_ref[...], q.astype(cdt), preferred_element_type=f32)       # (TB*ne, D)

    # Per-head q.k scores: elementwise product then block-diagonal head reduction.
    scores = jnp.dot((k * q_rows).astype(cdt), msk_ref[...],
                     preferred_element_type=f32)                                    # (TB*ne, H)

    # Softmax over the ne entities of each batch element, per head.  A softmax is
    # shift-invariant per segment, so subtract the tile-global per-head max (cheap
    # sublane reduce) for overflow safety, clamp at -80 so exp never fully
    # underflows, and guard the denominator with an epsilon.
    # TODO(synk): an exact per-segment max (strided scratch reads) would be needed
    # only for tiles mixing segments whose score ranges differ by > ~80.
    scores = scores - jnp.max(scores, axis=0, keepdims=True)
    scores = jnp.maximum(scores, -80.0)
    e = jnp.exp(scores)                                                             # (TB*ne, H) f32
    denom = jnp.dot(rept_ref[...], e.astype(cdt), preferred_element_type=f32)       # (TB, H)
    inv = pl.reciprocal(denom + 1e-30, approx=True)                                 # EUP slot
    att = e * jnp.dot(rep_ref[...], inv.astype(cdt), preferred_element_type=f32)    # (TB*ne, H)

    # Expand per-head attention weights back to the full 128 lanes and reduce each
    # batch element's entity rows (another 0/1 matmul) -> (TB, D).
    att_d = jnp.dot(att.astype(cdt), mskt_ref[...], preferred_element_type=f32)     # (TB*ne, D)
    out = jnp.dot(rept_ref[...], (v * att_d).astype(cdt),
                  preferred_element_type=f32)                                       # (TB, D)
    o_ref[...] = out.astype(o_ref.dtype)


def _default_block_b(bs, ne, compute_dtype):
    """Batch-tile size: large enough to amortise the ~0.35us per-grid-step overhead
    and fill the MXU (target 128 so rep@q's K dimension is full depth), small enough
    that (a) the double-buffered feature tile AND the O(TB^2*ne) rep/rept matrices
    stay far below every chip's scoped-VMEM default (v5e 16 MiB / v7x 32 MiB),
    (b) the quadratic rep/rept MXU flops stay <= ~1/3 of MACs on the slow f32 path,
    and (c) v7x's two TensorCores both get grid steps."""
    dt = jnp.dtype(compute_dtype)
    itemsize = dt.itemsize
    align = 16 if itemsize < 4 else 8          # bf16 packs two rows per sublane
    tb = 128

    # f32 matmuls are the binding MXU path: cap TB so rep/rept work <= ~1/3 of MACs.
    if itemsize >= 4:
        cap = (D * (2 * ne + 1)) // (4 * ne)
        tb = min(tb, max(align, (cap // align) * align))

    # VMEM budget: feature tile + first-entity tile + rep/rept + output, all
    # double-buffered, plus the fused weights.
    def vmem_bytes(t):
        rows = t * ne
        return (2 * rows * D * itemsize        # feature tile
                + 2 * t * D * itemsize         # first-entity tile
                + 4 * t * rows * itemsize      # rep + rept (2 buffers each)
                + 2 * t * D * 4                # f32 output tile
                + 2 * 3 * D * D * itemsize)    # Wq + fused Wk|Wv
    budget = 12 << 20
    while tb > align and vmem_bytes(tb) > budget:
        tb -= align

    # v7x has 2 TensorCores per chip: prefer >= 2 grid steps over one oversized step.
    if bs > align and _round_up(bs, tb) // tb < 2:
        tb = max(align, _round_up(_round_up(bs, 2 * align) // 2, align))

    return max(align, min(tb, _round_up(bs, align)))


def asn_attention_forward_i(features, params, *, block_b=None,
                            compute_dtype=jnp.bfloat16, out_dtype=jnp.float32):
    """Pallas implementation of ASNAttention.forward_i. features: (bs, ne, D) -> (bs, D)."""
    wq, wk, wv, bq, bk, bv = params
    bs, ne, d = features.shape
    assert d == D

    cdt = jnp.dtype(compute_dtype)
    align = 16 if cdt.itemsize < 4 else 8
    tb = (_default_block_b(bs, ne, compute_dtype) if block_b is None
          else max(align, _round_up(block_b, align)))
    bs_pad = _round_up(bs, tb)
    if bs_pad != bs:
        features = jnp.pad(features, ((0, bs_pad - bs), (0, 0), (0, 0)))

    feat = features.astype(cdt)
    x_flat = feat.reshape(bs_pad * ne, D)      # all entity rows (k/v input)
    # TODO(synk): q rows could be read in-kernel via xk_ref[pl.ds(0, tb, stride=ne)]
    # to drop this second input; kept separate until that strided-vld lowering is
    # verified on all generations.
    x_first = feat[:, 0, :]                    # first-entity rows (q input)

    wq_c = wq.astype(cdt)
    wkv = jnp.concatenate([wk, wv], axis=1).astype(cdt)             # (D, 2D)
    bq_c = bq.astype(jnp.float32)
    bkv = jnp.concatenate([bk, bv], axis=1).astype(jnp.float32)     # (1, 2D)

    m_hd, m_t = _head_masks(cdt.name)
    rep, rep_t = _segment_matrices(tb, ne, cdt.name)
    nrows = tb * ne

    out = pl.pallas_call(
        _asn_attention_kernel,
        out_shape=jax.ShapeDtypeStruct((bs_pad, D), out_dtype),
        grid_spec=pltpu.PrefetchScalarGridSpec(
            num_scalar_prefetch=0,
            grid=(bs_pad // tb,),
            in_specs=[
                pl.BlockSpec((nrows, D), lambda i: (i, 0)),      # entity rows (k/v)
                pl.BlockSpec((tb, D), lambda i: (i, 0)),         # first-entity rows (q)
                pl.BlockSpec((D, D), lambda i: (0, 0)),          # Wq
                pl.BlockSpec((D, 2 * D), lambda i: (0, 0)),      # fused Wk|Wv
                pl.BlockSpec((1, D), lambda i: (0, 0)),          # bq
                pl.BlockSpec((1, 2 * D), lambda i: (0, 0)),      # fused bk|bv
                pl.BlockSpec((D, HEADS), lambda i: (0, 0)),      # head mask
                pl.BlockSpec((HEADS, D), lambda i: (0, 0)),      # head mask^T
                pl.BlockSpec((nrows, tb), lambda i: (0, 0)),     # segment repeat matrix
                pl.BlockSpec((tb, nrows), lambda i: (0, 0)),     # segment sum matrix
            ],
            out_specs=pl.BlockSpec((tb, D), lambda i: (i, 0)),
        ),
        compiler_params=pltpu.CompilerParams(
            dimension_semantics=("parallel",),
            vmem_limit_bytes=32 * 1024 * 1024),
    )(x_flat, x_first, wq_c, wkv, bq_c, bkv, m_hd, m_t, rep, rep_t)

    return out[:bs] if bs_pad != bs else out


def asn_attention_forward(features_list, params, **kwargs):
    """Mirrors ASNAttention.forward: list of (bs, ne, D) -> list of (bs, D).

    Entries sharing (ne, D) are concatenated along the batch axis and run in a
    single pallas_call so the weights/masks are staged into VMEM once and the
    grid is as long as possible.
    """
    groups = {}
    for idx, f in enumerate(features_list):
        groups.setdefault(f.shape[1:], []).append(idx)
    outs = [None] * len(features_list)
    for idxs in groups.values():
        stacked = (features_list[idxs[0]] if len(idxs) == 1
                   else jnp.concatenate([features_list[i] for i in idxs], axis=0))
        res = asn_attention_forward_i(stacked, params, **kwargs)
        off = 0
        for i in idxs:
            b = features_list[i].shape[0]
            outs[i] = res[off:off + b]
            off += b
    return outs


# ----------------------------- reference (plain JAX) -----------------------------
def reference_forward_i(features, params):
    wq, wk, wv, bq, bk, bv = params
    bs, ne, _ = features.shape
    q = (features[:, :1, :] @ wq + bq).reshape(bs, 1, HEADS, EMB_DIM)
    k = (features @ wk + bk).reshape(bs, ne, HEADS, EMB_DIM)
    v = (features @ wv + bv).reshape(bs, ne, HEADS, EMB_DIM)
    q = jnp.transpose(q, (0, 2, 1, 3)).reshape(bs * HEADS, 1, EMB_DIM)
    k = jnp.transpose(k, (0, 2, 1, 3)).reshape(bs * HEADS, ne, EMB_DIM)
    v = jnp.transpose(v, (0, 2, 1, 3)).reshape(bs * HEADS, ne, EMB_DIM)
    dot = jax.nn.softmax(jnp.einsum('bqd,bkd->bqk', q, k) / SQRT_EMB, axis=-1)
    out = jnp.einsum('bqk,bkd->bqd', dot, v).reshape(bs, HEADS, 1, EMB_DIM)
    out = jnp.transpose(out, (0, 2, 1, 3)).reshape(bs, HEADS * EMB_DIM)
    return out


# ----------------------------- deterministic init -----------------------------
def _orthogonal(key, n, gain=1.0):
    a = jax.random.normal(key, (n, n), dtype=jnp.float32)
    q, r = jnp.linalg.qr(a)
    q = q * jnp.sign(jnp.diagonal(r))[None, :]
    return (gain * q).astype(jnp.float32)


def make_params(key, gain=0.01):
    kq, kk, kv = jax.random.split(key, 3)
    # stored as (D_in, D_out) == torch W.T ; biases initialized to 0 as in init_()
    wq = _orthogonal(kq, D, gain)
    wk = _orthogonal(kk, D, gain)
    wv = _orthogonal(kv, D, gain)
    bq = jnp.zeros((1, D), jnp.float32)
    bk = jnp.zeros((1, D), jnp.float32)
    bv = jnp.zeros((1, D), jnp.float32)
    return wq, wk, wv, bq, bk, bv


if __name__ == "__main__":
    key = jax.random.PRNGKey(0)
    kparam, kf0, kf1 = jax.random.split(key, 3)

    params = make_params(kparam, gain=0.01)

    # Two feature tensors (as ASN_G_Atten's per-map list); same (ne, D) so they get
    # fused into one pallas_call; batch sizes exercise padding + a multi-step grid.
    features_list = [
        jax.random.normal(kf0, (12, 8, D), dtype=jnp.float32),
        jax.random.normal(kf1, (5, 8, D), dtype=jnp.float32),
    ]
    refs = [reference_forward_i(f, params) for f in features_list]

    # Default path: bf16 features/weights/0-1-matrix operands, f32 accumulation,
    # auto-selected batch tile (>= 2 grid steps for v7x's two TensorCores).
    outs_bf16 = asn_attention_forward(features_list, params)
    outs_bf16 = [jax.block_until_ready(o) for o in outs_bf16]
    for o, r in zip(outs_bf16, refs):
        np.testing.assert_allclose(np.asarray(o), np.asarray(r), rtol=5e-2, atol=5e-4)

    # Full-f32 path (strict tolerance), explicit small batch tile -> multi-step grid
    # + padding with the quadratic-rep / f32-MXU cap exercised via block_b.
    outs_f32 = asn_attention_forward(features_list, params,
                                     block_b=8, compute_dtype=jnp.float32)
    outs_f32 = [jax.block_until_ready(o) for o in outs_f32]
    for o, r in zip(outs_f32, refs):
        np.testing.assert_allclose(np.asarray(o), np.asarray(r), rtol=5e-3, atol=1e-5)

    print("KERNEL_OK")
</pallas_src>

<mosaic_0001>
module attributes {stable_mosaic.version = 11 : i64} {
  func.func @_asn_attention_kernel(%arg0: i32, %arg1: memref<128x128xbf16, #tpu.memory_space<vmem>>, %arg2: memref<16x128xbf16, #tpu.memory_space<vmem>>, %arg3: memref<128x128xbf16, #tpu.memory_space<vmem>>, %arg4: memref<128x256xbf16, #tpu.memory_space<vmem>>, %arg5: memref<1x128xf32, #tpu.memory_space<vmem>>, %arg6: memref<1x256xf32, #tpu.memory_space<vmem>>, %arg7: memref<128x4xbf16, #tpu.memory_space<vmem>>, %arg8: memref<4x128xbf16, #tpu.memory_space<vmem>>, %arg9: memref<128x16xbf16, #tpu.memory_space<vmem>>, %arg10: memref<16x128xbf16, #tpu.memory_space<vmem>>, %arg11: memref<16x128xf32, #tpu.memory_space<vmem>>) attributes {dimension_semantics = [#tpu.dimension_semantics<parallel>], iteration_bounds = array<i64: 2>, scalar_prefetch = 0 : i64, scratch_operands = 0 : i64, tpu.core_type = #tpu.core_type<tc>, window_params = [{transform_indices = @transform_0, window_bounds = array<i64: 128, 128>}, {transform_indices = @transform_1, window_bounds = array<i64: 16, 128>}, {pipeline_mode = #tpu.pipeline_mode<synchronous>, transform_indices = @transform_2, window_bounds = array<i64: 128, 128>}, {pipeline_mode = #tpu.pipeline_mode<synchronous>, transform_indices = @transform_3, window_bounds = array<i64: 128, 256>}, {pipeline_mode = #tpu.pipeline_mode<synchronous>, transform_indices = @transform_4, window_bounds = array<i64: 1, 128>}, {pipeline_mode = #tpu.pipeline_mode<synchronous>, transform_indices = @transform_5, window_bounds = array<i64: 1, 256>}, {pipeline_mode = #tpu.pipeline_mode<synchronous>, transform_indices = @transform_6, window_bounds = array<i64: 128, 4>}, {pipeline_mode = #tpu.pipeline_mode<synchronous>, transform_indices = @transform_7, window_bounds = array<i64: 4, 128>}, {pipeline_mode = #tpu.pipeline_mode<synchronous>, transform_indices = @transform_8, window_bounds = array<i64: 128, 16>}, {pipeline_mode = #tpu.pipeline_mode<synchronous>, transform_indices = @transform_9, window_bounds = array<i64: 16, 128>}, {transform_indices = @transform_10, window_bounds = array<i64: 16, 128>}]} {
    %c0 = arith.constant 0 : index
    %c0_0 = arith.constant 0 : index
    %0 = vector.load %arg2[%c0, %c0_0] : memref<16x128xbf16, #tpu.memory_space<vmem>>, vector<16x128xbf16>
    %c0_1 = arith.constant 0 : index
    %c0_2 = arith.constant 0 : index
    %1 = vector.load %arg3[%c0_1, %c0_2] : memref<128x128xbf16, #tpu.memory_space<vmem>>, vector<128x128xbf16>
    %cst = arith.constant dense<0.000000e+00> : vector<16x128xf32>
    %2 = tpu.matmul %0, %1, %cst {dimension_numbers = #tpu.dot_dimension_numbers<[1], [0], [0], [1], [0, 0, 1, 1], [], []>} : vector<16x128xbf16>, vector<128x128xbf16>, vector<16x128xf32> -> vector<16x128xf32>
    %c0_3 = arith.constant 0 : index
    %c0_4 = arith.constant 0 : index
    %3 = vector.load %arg5[%c0_3, %c0_4] : memref<1x128xf32, #tpu.memory_space<vmem>>, vector<1x128xf32>
    %4 = vector.broadcast %3 : vector<1x128xf32> to vector<16x128xf32>
    %5 = arith.addf %2, %4 : vector<16x128xf32>
    %cst_5 = arith.constant 0.176776692 : f32
    %6 = vector.broadcast %cst_5 : f32 to vector<16x128xf32>
    %7 = arith.mulf %5, %6 : vector<16x128xf32>
    %c0_6 = arith.constant 0 : index
    %c0_7 = arith.constant 0 : index
    %8 = vector.load %arg1[%c0_6, %c0_7] : memref<128x128xbf16, #tpu.memory_space<vmem>>, vector<128x128xbf16>
    %c0_8 = arith.constant 0 : index
    %c0_9 = arith.constant 0 : index
    %9 = vector.load %arg4[%c0_8, %c0_9] : memref<128x256xbf16, #tpu.memory_space<vmem>>, vector<128x256xbf16>
    %cst_10 = arith.constant dense<0.000000e+00> : vector<128x256xf32>
    %10 = tpu.matmul %8, %9, %cst_10 {dimension_numbers = #tpu.dot_dimension_numbers<[1], [0], [0], [1], [0, 0, 1, 1], [], []>} : vector<128x128xbf16>, vector<128x256xbf16>, vector<128x256xf32> -> vector<128x256xf32>
    %c0_11 = arith.constant 0 : index
    %c0_12 = arith.constant 0 : index
    %11 = vector.load %arg6[%c0_11, %c0_12] : memref<1x256xf32, #tpu.memory_space<vmem>>, vector<1x256xf32>
    %12 = vector.broadcast %11 : vector<1x256xf32> to vector<128x256xf32>
    %13 = arith.addf %10, %12 : vector<128x256xf32>
    %14 = vector.extract_strided_slice %13 {offsets = [0, 0], sizes = [128, 128], strides = [1, 1]} : vector<128x256xf32> to vector<128x128xf32>
    %15 = vector.extract_strided_slice %13 {offsets = [0, 128], sizes = [128, 128], strides = [1, 1]} : vector<128x256xf32> to vector<128x128xf32>
    %c0_13 = arith.constant 0 : index
    %c0_14 = arith.constant 0 : index
    %16 = vector.load %arg9[%c0_13, %c0_14] : memref<128x16xbf16, #tpu.memory_space<vmem>>, vector<128x16xbf16>
    %17 = arith.truncf %7 : vector<16x128xf32> to vector<16x128xbf16>
    %cst_15 = arith.constant dense<0.000000e+00> : vector<128x128xf32>
    %18 = tpu.matmul %16, %17, %cst_15 {dimension_numbers = #tpu.dot_dimension_numbers<[1], [0], [0], [1], [0, 0, 1, 1], [], []>} : vector<128x16xbf16>, vector<16x128xbf16>, vector<128x128xf32> -> vector<128x128xf32>
    %19 = arith.mulf %14, %18 : vector<128x128xf32>
    %20 = arith.truncf %19 : vector<128x128xf32> to vector<128x128xbf16>
    %c0_16 = arith.constant 0 : index
    %c0_17 = arith.constant 0 : index
    %21 = vector.load %arg7[%c0_16, %c0_17] : memref<128x4xbf16, #tpu.memory_space<vmem>>, vector<128x4xbf16>
    %cst_18 = arith.constant dense<0.000000e+00> : vector<128x4xf32>
    %22 = tpu.matmul %20, %21, %cst_18 {dimension_numbers = #tpu.dot_dimension_numbers<[1], [0], [0], [1], [0, 0, 1, 1], [], []>} : vector<128x128xbf16>, vector<128x4xbf16>, vector<128x4xf32> -> vector<128x4xf32>
    %cst_19 = arith.constant dense<0xFF800000> : vector<4xf32>
    %23 = vector.multi_reduction <maximumf>, %22, %cst_19 [0] : vector<128x4xf32> to vector<4xf32>
    %24 = vector.shape_cast %23 : vector<4xf32> to vector<1x4xf32>
    %25 = vector.broadcast %24 : vector<1x4xf32> to vector<128x4xf32>
    %26 = arith.subf %22, %25 : vector<128x4xf32>
    %cst_20 = arith.constant -8.000000e+01 : f32
    %27 = vector.broadcast %cst_20 : f32 to vector<128x4xf32>
    %28 = arith.maximumf %26, %27 : vector<128x4xf32>
    %29 = math.exp %28 : vector<128x4xf32>
    %c0_21 = arith.constant 0 : index
    %c0_22 = arith.constant 0 : index
    %30 = vector.load %arg10[%c0_21, %c0_22] : memref<16x128xbf16, #tpu.memory_space<vmem>>, vector<16x128xbf16>
    %31 = arith.truncf %29 : vector<128x4xf32> to vector<128x4xbf16>
    %cst_23 = arith.constant dense<0.000000e+00> : vector<16x4xf32>
    %32 = tpu.matmul %30, %31, %cst_23 {dimension_numbers = #tpu.dot_dimension_numbers<[1], [0], [0], [1], [0, 0, 1, 1], [], []>} : vector<16x128xbf16>, vector<128x4xbf16>, vector<16x4xf32> -> vector<16x4xf32>
    %cst_24 = arith.constant 1.000000e-30 : f32
    %33 = vector.broadcast %cst_24 : f32 to vector<16x4xf32>
    %34 = arith.addf %32, %33 : vector<16x4xf32>
    %35 = tpu.reciprocal %34 {approx = true} : vector<16x4xf32> -> vector<16x4xf32>
    %c0_25 = arith.constant 0 : index
    %c0_26 = arith.constant 0 : index
    %36 = vector.load %arg9[%c0_25, %c0_26] : memref<128x16xbf16, #tpu.memory_space<vmem>>, vector<128x16xbf16>
    %37 = arith.truncf %35 : vector<16x4xf32> to vector<16x4xbf16>
    %cst_27 = arith.constant dense<0.000000e+00> : vector<128x4xf32>
    %38 = tpu.matmul %36, %37, %cst_27 {dimension_numbers = #tpu.dot_dimension_numbers<[1], [0], [0], [1], [0, 0, 1, 1], [], []>} : vector<128x16xbf16>, vector<16x4xbf16>, vector<128x4xf32> -> vector<128x4xf32>
    %39 = arith.mulf %29, %38 : vector<128x4xf32>
    %40 = arith.truncf %39 : vector<128x4xf32> to vector<128x4xbf16>
    %c0_28 = arith.constant 0 : index
    %c0_29 = arith.constant 0 : index
    %41 = vector.load %arg8[%c0_28, %c0_29] : memref<4x128xbf16, #tpu.memory_space<vmem>>, vector<4x128xbf16>
    %cst_30 = arith.constant dense<0.000000e+00> : vector<128x128xf32>
    %42 = tpu.matmul %40, %41, %cst_30 {dimension_numbers = #tpu.dot_dimension_numbers<[1], [0], [0], [1], [0, 0, 1, 1], [], []>} : vector<128x4xbf16>, vector<4x128xbf16>, vector<128x128xf32> -> vector<128x128xf32>
    %c0_31 = arith.constant 0 : index
    %c0_32 = arith.constant 0 : index
    %43 = vector.load %arg10[%c0_31, %c0_32] : memref<16x128xbf16, #tpu.memory_space<vmem>>, vector<16x128xbf16>
    %44 = arith.mulf %15, %42 : vector<128x128xf32>
    %45 = arith.truncf %44 : vector<128x128xf32> to vector<128x128xbf16>
    %cst_33 = arith.constant dense<0.000000e+00> : vector<16x128xf32>
    %46 = tpu.matmul %43, %45, %cst_33 {dimension_numbers = #tpu.dot_dimension_numbers<[1], [0], [0], [1], [0, 0, 1, 1], [], []>} : vector<16x128xbf16>, vector<128x128xbf16>, vector<16x128xf32> -> vector<16x128xf32>
    %c0_34 = arith.constant 0 : index
    %c0_35 = arith.constant 0 : index
    %47 = vector.load %arg11[%c0_34, %c0_35] : memref<16x128xf32, #tpu.memory_space<vmem>>, vector<16x128xf32>
    tpu.vector_store %arg11[%c0_34, %c0_35], %46 {strides = array<i32>} : memref<16x128xf32, #tpu.memory_space<vmem>>, vector<16x128xf32>,
    return
  }
  func.func @transform_0(%arg0: i32) -> (i32, i32) {
    %c0_i32 = arith.constant 0 : i32
    %c0_i32_0 = arith.constant 0 : i32
    return %arg0, %c0_i32 : i32, i32
  }
  func.func @transform_1(%arg0: i32) -> (i32, i32) {
    %c0_i32 = arith.constant 0 : i32
    %c0_i32_0 = arith.constant 0 : i32
    return %arg0, %c0_i32 : i32, i32
  }
  func.func @transform_2(%arg0: i32) -> (i32, i32) {
    %c0_i32 = arith.constant 0 : i32
    %c0_i32_0 = arith.constant 0 : i32
    %c0_i32_1 = arith.constant 0 : i32
    return %c0_i32, %c0_i32_0 : i32, i32
  }
  func.func @transform_3(%arg0: i32) -> (i32, i32) {
    %c0_i32 = arith.constant 0 : i32
    %c0_i32_0 = arith.constant 0 : i32
    %c0_i32_1 = arith.constant 0 : i32
    return %c0_i32, %c0_i32_0 : i32, i32
  }
  func.func @transform_4(%arg0: i32) -> (i32, i32) {
    %c0_i32 = arith.constant 0 : i32
    %c0_i32_0 = arith.constant 0 : i32
    %c0_i32_1 = arith.constant 0 : i32
    return %c0_i32, %c0_i32_0 : i32, i32
  }
  func.func @transform_5(%arg0: i32) -> (i32, i32) {
    %c0_i32 = arith.constant 0 : i32
    %c0_i32_0 = arith.constant 0 : i32
    %c0_i32_1 = arith.constant 0 : i32
    return %c0_i32, %c0_i32_0 : i32, i32
  }
  func.func @transform_6(%arg0: i32) -> (i32, i32) {
    %c0_i32 = arith.constant 0 : i32
    %c0_i32_0 = arith.constant 0 : i32
    %c0_i32_1 = arith.constant 0 : i32
    return %c0_i32, %c0_i32_0 : i32, i32
  }
  func.func @transform_7(%arg0: i32) -> (i32, i32) {
    %c0_i32 = arith.constant 0 : i32
    %c0_i32_0 = arith.constant 0 : i32
    %c0_i32_1 = arith.constant 0 : i32
    return %c0_i32, %c0_i32_0 : i32, i32
  }
  func.func @transform_8(%arg0: i32) -> (i32, i32) {
    %c0_i32 = arith.constant 0 : i32
    %c0_i32_0 = arith.constant 0 : i32
    %c0_i32_1 = arith.constant 0 : i32
    return %c0_i32, %c0_i32_0 : i32, i32
  }
  func.func @transform_9(%arg0: i32) -> (i32, i32) {
    %c0_i32 = arith.constant 0 : i32
    %c0_i32_0 = arith.constant 0 : i32
    %c0_i32_1 = arith.constant 0 : i32
    return %c0_i32, %c0_i32_0 : i32, i32
  }
  func.func @transform_10(%arg0: i32) -> (i32, i32) {
    %c0_i32 = arith.constant 0 : i32
    %c0_i32_0 = arith.constant 0 : i32
    return %arg0, %c0_i32 : i32, i32
  }
}

</mosaic_0001>

<bundles_post_ra>
// kernel: tpu_custom_call.1
= control target key start
LH: loop header
LB: loop body
LE: loop exit
PB: predicated region body
PF: predicated region fallthrough
CT: control target
= control target key end

     0   :  { %15 = vsyncpa [#allocation3], 0  ;;  %s3174_s0 = inlined_call_operand.vmem [shape: bf16[256,128], index: 0, kind: input, shape index: {}]   ;;  %s3175_s1 = inlined_call_operand.hbm [shape: bf16[32,128], index: 1, kind: input, shape index: {}]   ;;  %s3176_s2 = inlined_call_operand.hbm [shape: bf16[128,128], index: 2, kind: input, shape index: {}]   ;;  %s3177_s3 = inlined_call_operand.hbm [shape: bf16[128,256], index: 3, kind: input, shape index: {}]   ;;  %s3178_s4 = inlined_call_operand.vmem [shape: f32[1,128], index: 4, kind: input, shape index: {}]   ;;  %s3179_s5 = inlined_call_operand.vmem [shape: f32[1,256], index: 5, kind: input, shape index: {}]   ;;  %s3180_s6 = inlined_call_operand.vmem [shape: bf16[128,4], index: 6, kind: input, shape index: {}]   ;;  %s3181_s7 = inlined_call_operand.vmem [shape: bf16[4,128], index: 7, kind: input, shape index: {}]   ;;  %s3182_s8 = inlined_call_operand.vmem [shape: bf16[128,16], index: 8, kind: input, shape index: {}]   ;;  %s3183_s9 = inlined_call_operand.vmem [shape: bf16[16,128], index: 9, kind: input, shape index: {}]   ;;  %s3184_s10 = inlined_call_operand.hbm [shape: f32[32,128], index: 10, kind: output, shape index: {}]  }
   0x1   :  { %17 = vsyncpa [#allocation3 + $0x1], 0 }
   0x2   :  { %18 = vsyncpa [#allocation6], 0 }
   0x3   :  { %19 = vsyncpa [#allocation4], 0 }
   0x4   :  { %21 = vsyncpa [#allocation4 + $0x1], 0  ;;  %s2507_s13 = smov 0   ;;  %s2509_s14 = smov 0  }
   0x5   :  { %s2511_s15 = smov 0   ;;  %s2513_s16 = smov 0  }
   0x6 LB: > { %3192 = sst [smem:[#allocation12_spill]] %s2425_s13  ;;  %s2528_s17 = sadd.s32 4294967295, %s2437_s16   ;;  %s2437_s16 = sphi %s2513_s16, %s3214_s16   ;;  %s2433_s15 = sphi %s2511_s15, %s3213_s15   ;;  %s2429_s14 = sphi %s2509_s14, %s3212_s14   ;;  %s2425_s13 = sphi %s2507_s13, %s3211_s13  }
   0x7   : > { %s1797_s18 = sadd.s32 4294967294, %s2437_s16   ;;  %p73_p0 = scmp.ne.s32.totalorder %s2429_s14, %s2425_s13 }
   0x8   : > { %p3185_p1 = scmp.eq.s32.totalorder %s2528_s17, 0  ;;  %p271_p3 = scmp.eq.s32.totalorder %s1797_s18, 1 }
   0x9   : > { %p1798_p5 = scmp.ge.s32.totalorder %s2437_s16, 1  ;;  %p278_p7 = scmp.lt.s32.totalorder %s2437_s16, 3 }
   0xa   : > { %p2537_p4 = por %p3185_p1, %p73_p0  ;;  %p2542_p6 = por %p271_p3, %p73_p0 }
   0xb   : > { %p2547_p8 = pnand %p1798_p5, %p278_p7  ;;  %s2439_s22 = smov [#allocation5]  }
   0xc   : > { %s3193_s19 = scalar_select %p2537_p4, 1, 0 }
   0xd   : > { %s3194_s20 = scalar_select %p2542_p6, 1, 0 }
   0xe   : > { %s290_s23 = sshll.u32 %s2439_s22, 4  ;;  %p2123_p9 = pneg %p2547_p8  ;;  %s2551_s23 = int_to_ptr.vmem [resolvable:$true] %s290_s23 }
   0xf   : > { %3195 = sst [smem:[#allocation13_spill]] %s3194_s20  ;;  %s2440_s25 = smov [#allocation7]  }
  0x10   : > { %p2558_p11 = pnand %p2123_p9, %p3185_p1  ;;  %s303_s26 = sshll.u32 %s2440_s25, 4  ;;  %s2562_s26 = int_to_ptr.vmem [resolvable:$true] %s303_s26 }
  0x11   : > { %s2281_s29 = scalar_lea.hbm %s3176_s2, 1024 }
  0x12   : > { %p2282_p12 = scmp.ne.s32.totalorder %s3176_s2, %s2281_s29  ;;  %p2283_p13 = pneg %p2558_p11 }
  0x13   : > { %p2288_p5 = scmp.lt.u32.totalorder %s2281_s29, %s3176_s2 }
  0x14   : > { %p2284_p0 = pnand %p2283_p13, %p2282_p12 }
  0x16   : > { %p2285_p3 = pneg %p2284_p0 }
  0x18   : > { %p2290_p7 = pnand %p2288_p5, %p2285_p3 }
  0x1a   : > { %2293 = shalt.err (!%p2290_p7)
}
  0x1b   : > { %s2294_s22 = scalar_lea.vmem %s2551_s23, 1024  ;;  %p2302_p2 = scmp.lt.s32.totalorder %s2551_s23, %s2551_s23 }
  0x1c   : > { %p2295_p9 = scmp.ne.s32.totalorder %s2551_s23, %s2294_s22  ;;  %p2303_p12 = scmp.lt.s32.totalorder %s2294_s22, %s2294_s22 }
  0x1e   : > { %p2297_p10 = pnand %p2295_p9, %p2283_p13  ;;  %p2304_p0 = por %p2303_p12, %p2302_p2 }
  0x20   : > { %p2298_p1 = pneg %p2297_p10 }
  0x22   : > { %p2305_p6 = pnand %p2304_p0, %p2298_p1 }
  0x24   : > { %2308 = shalt.err (!%p2305_p6)
}
  0x25   : > { %s3188_s25 = smov 64   ;;  %s3189_s27 = smov 4  }
  0x26   : > { %2126 = dma.hbm_to_vmem [thread:$0]  (!%p2558_p11), %s3176_s2, 1024, %s2551_s23, [#allocation6], %s3188_s25, %s3188_s25, %s3189_s27  }
  0x27   : > { %s2309_s12 = scalar_lea.hbm %s3177_s3, 2048 }
  0x28   : > { %p2310_p1 = scmp.ne.s32.totalorder %s3177_s3, %s2309_s12  ;;  %p2316_p10 = scmp.lt.u32.totalorder %s2309_s12, %s3177_s3 }
  0x2a   : > { %p2312_p2 = pnand %p2310_p1, %p2283_p13 }
  0x2c   : > { %p2313_p6 = pneg %p2312_p2 }
  0x2e   : > { %p2318_p3 = pnand %p2316_p10, %p2313_p6 }
  0x30   : > { %2321 = shalt.err (!%p2318_p3)
}
  0x31   : > { %s2322_s23 = scalar_lea.vmem %s2562_s26, 2048  ;;  %p2330_p12 = scmp.lt.s32.totalorder %s2562_s26, %s2562_s26 }
  0x32   : > { %p2323_p5 = scmp.ne.s32.totalorder %s2562_s26, %s2322_s23  ;;  %p2331_p0 = scmp.lt.s32.totalorder %s2322_s23, %s2322_s23 }
  0x34   : > { %p2325_p7 = pnand %p2323_p5, %p2283_p13  ;;  %p2332_p1 = por %p2331_p0, %p2330_p12 }
  0x36   : > { %p2326_p9 = pneg %p2325_p7 }
  0x38   : > { %p2333_p2 = pnand %p2332_p1, %p2326_p9 }
  0x3a   : > { %2336 = shalt.err (!%p2333_p2)
}
  0x3b   : > { %s2443_s13 = smov 128   ;;  %s2444_s20 = smov 8  }
  0x3c   : > { %2129 = dma.hbm_to_vmem [thread:$0]  (!%p2558_p11), %s3177_s3, 2048, %s2562_s26, [#allocation6], %s2443_s13, %s2443_s13, %s2444_s20  }
  0x3d   : > { %s2620_s30 = sadd.s32 1, %s2437_s16   ;;  %s60_s12 = sadd.s32 1, %s2433_s15 }
  0x3e   : > { %s57_s11 = ssub.s32 %s2437_s16, %s2620_s30  ;;  %p67_p6 = scmp.ne.s32.totalorder %s2433_s15, %s2429_s14 }
  0x3f   : > { %p58_p13 = scmp.eq.s32.totalorder %s57_s11, 0  ;;  %p68_p10 = scmp.eq.s32.totalorder %s2437_s16, 0 }
  0x40   : > { %p3198_p5 = scmp.eq.s32.totalorder %s2528_s17, 1  ;;  %p2140_p9 = scmp.lt.s32.totalorder %s2437_s16, 2 }
  0x41   : > { %s2629_s18 = scalar_select %p58_p13, %s2433_s15, %s60_s12  }
  0x42   : > { %p69_p3 = por %p68_p10, %p67_p6  ;;  %p2633_p7 = por %p3198_p5, %p67_p6 }
  0x43   : > { %s344_s24 = sand.u32 1, %s2433_s15   ;;  %s1892_s26 = sshll.u32 %s2437_s16, 7 }
  0x44   : > { %s3199_s22 = scalar_select %p2633_p7, 1, 0 }
  0x45   : > { %s1802_s23 = sshll.u32 %s344_s24, 3  ;;  %s2643_s28 = scalar_lea.hbm %s3175_s1, %s1892_s26 }
  0x46   : > { %s348_s29 = scalar_lea.vmem [#allocation2], %s1802_s23  ;;  %p2647_p11 = pnand %p2140_p9, %p69_p3 }
  0x47   : > { %s355_s11 = sshll.u32 %s348_s29, 4  ;;  %s2651_s25 = scalar_lea.sflag [#allocation3], %s344_s24  ;;  %s2645_s11 = int_to_ptr.vmem [resolvable:$true] %s355_s11 }
  0x48   : > { %s2337_s27 = scalar_lea.hbm %s2643_s28, 128  ;;  %p2339_p0 = pneg %p2647_p11 }
  0x49   : > { %p2338_p12 = scmp.ne.s32.totalorder %s2643_s28, %s2337_s27  ;;  %s2342_s13 = scalar_lea.hbm %s3175_s1, 256 }
  0x4a   : > { %p2343_p13 = scmp.lt.u32.totalorder %s2643_s28, %s3175_s1  ;;  %p2344_p6 = scmp.lt.u32.totalorder %s2342_s13, %s2337_s27 }
  0x4b   : > { %p2340_p1 = pnand %p2339_p0, %p2338_p12  ;;  %p2346_p3 = scmp.lt.u32.totalorder %s2337_s27, %s2643_s28 }
  0x4c   : > { %p2345_p10 = por %p2344_p6, %p2343_p13 }
  0x4d   : > { %p2341_p2 = pneg %p2340_p1 }
  0x4e   : > { %p2347_p5 = por %p2346_p3, %p2345_p10 }
  0x50   : > { %p2348_p9 = pnand %p2347_p5, %p2341_p2 }
  0x52   : > { %2351 = shalt.err (!%p2348_p9)
}
  0x53   : > { %s2352_s24 = scalar_lea.vmem %s2645_s11, 128  ;;  %s2445_s23 = smov [#allocation2]  }
  0x54   : > { %p2353_p12 = scmp.ne.s32.totalorder %s2645_s11, %s2352_s24  ;;  %s2357_s26 = sshll.u32 %s2445_s23, 4  ;;  %s2358_s26 = int_to_ptr.vmem [resolvable:$false] %s2357_s26 }
  0x55   : > { %s2359_s20 = scalar_lea.vmem %s2358_s26, 256  ;;  %p2360_p4 = scmp.lt.s32.totalorder %s2645_s11, %s2358_s26 }
  0x56   : > { %p2355_p1 = pnand %p2353_p12, %p2339_p0  ;;  %p2361_p13 = scmp.lt.s32.totalorder %s2359_s20, %s2352_s24 }
  0x58   : > { %p2356_p7 = pneg %p2355_p1  ;;  %p2362_p6 = por %p2361_p13, %p2360_p4 }
  0x5a   : > { %p2363_p10 = pnand %p2362_p6, %p2356_p7 }
  0x5c   : > { %2366 = shalt.err (!%p2363_p10)
}
  0x5d   : > { %s3201_s27 = smov 4   ;;  %s3202_s13 = smov 64  }
  0x5e   : > { %2133 = dma.hbm_to_vmem [thread:$0]  (!%p2647_p11), %s2643_s28, 128, %s2645_s11, %s2651_s25, %s3202_s13, %s3202_s13, %s3201_s27  }
  0x5f   : > { %367 = sbr.rel (%p2547_p8) target bundleno = 1824 (0x720), region = 60  ;;  %s2685_s29 = sand.u32 (!%p2547_p8), 1, %s2429_s14  }
  0x60   : > { %s1806_s24 = sshll.u32 (!%p2547_p8), %s2685_s29, 3  ;;  %s370_s23 = scalar_lea.sflag (!%p2547_p8), [#allocation3], %s2685_s29 }
  0x61   : > { %s2689_s26 = scalar_lea.vmem (!%p2547_p8), [#allocation2], %s1806_s24  ;;  %p3203_p4 = scmp.ne.s32.totalorder (!%p2547_p8), %s3193_s19, 0 }
  0x66   : > { %2412 = dma.done.wait (%p3203_p4), %s370_s23, 128  }
  0x67   : > { %2414 = vsyncadd (%p3203_p4), %s370_s23, 4294967168  ;;  %p3204_p7 = scmp.eq.s32.totalorder %s2528_s17, 0 }
  0x69   : > { %2416 = dma.done.wait (%p3204_p7), [#allocation6], 3072   ;;  %p3205_p8 = pmov %p3204_p7 }
  0x6a   : > { %v2446_v0 = vmov 0.0   ;;  %vm2447_vm0 = vmmov 0   ;;  %v2448_v1 = vmov 0   ;;  %v2187_v2 = vld [vmem:[#allocation5] sm:$0xff]   ;;  %v2188_v3 = vld [vmem:[#allocation5 + $0x8] sm:$0xff]   ;;  %s1810_s19 = sshll.u32 %s2528_s17, 4  ;;  %v588_v36 = vlaneseq }
  0x6b   : > { %2418 = vsyncadd (%p3205_p8), [#allocation6], 4294964224  ;;  %1964 = vmatprep.subr.bf16.mxu0 %v2446_v0  ;;  %1980 = vmatprep.mubr.msk.bf16.mxu0 %vm2447_vm0, %v2446_v0  ;;  %v2189_v4 = vld [vmem:[#allocation5 + $0x10] sm:$0xff]   ;;  %p424_p11 = scmp.lt.s32.totalorder %s1810_s19, 31  ;;  %v2190_v5 = vld [vmem:[#allocation5 + $0x18] sm:$0xff]   ;;  %vm896_vm1 = vcmask 130048  }
  0x6c   : > { %758 = vmatprep.mubr.bf16.mxu1 %v2448_v1  ;;  %1965 = vmatpush3.bf16.msra.mxu0 %v2187_v2  ;;  %v2196_v6 = vld [vmem:[#allocation7 + $0x4] ss:$8 sps:$4 sm:$0xff]   ;;  %v2198_v7 = vld [vmem:[#allocation7] ss:$8 sps:$4 sm:$0xff]   ;;  %v2199_v8 = vld [vmem:[#allocation7 + $0x14] ss:$8 sps:$4 sm:$0xff]  }
  0x6d   : > { %1966 = vmatprep.subr.bf16.mxu0 %v2446_v0  ;;  %726 = vmatprep.subr.bf16.mxu1 %v2196_v6  ;;  %s3216_s19 = smov (!%p424_p11, %s1810_s19), 31  ;;  %v2201_v9 = vld [vmem:[#allocation7 + $0x10] ss:$8 sps:$4 sm:$0xff]   ;;  %v2202_v10 = vld [vmem:[#allocation7 + $0x24] ss:$8 sps:$4 sm:$0xff]   ;;  %v2742_v37 = vshrl.u32 %v588_v36, 7 }
  0x6e   : > { %727 = vmatpush1.bf16.msra.mxu1 %v2198_v7  ;;  %v2191_v11 = vld [vmem:[#allocation5 + $0x20] sm:$0xff]   ;;  %s1811_s21 = sshll.u32 %s3216_s19, 2  ;;  %v2205_v13 = vld [vmem:[#allocation7 + $0x34] ss:$8 sps:$4 sm:$0xff]   ;;  %v2192_v14 = vld [vmem:[#allocation5 + $0x28] sm:$0xff]   ;;  %vm1203_vm2 = vcmask 31744  }
  0x6f   : > { %728 = vmatprep.subr.bf16.mxu1 %v2199_v8  ;;  %v2204_v12 = vld [vmem:[#allocation7 + $0x20] ss:$8 sps:$4 sm:$0xff]   ;;  %s2711_s11 = scalar_lea.vmem %s3174_s0, %s1811_s21  ;;  %v2207_v15 = vld [vmem:[#allocation7 + $0x30] ss:$8 sps:$4 sm:$0xff]   ;;  %v2208_v16 = vld [vmem:[#allocation7 + $0x44] ss:$8 sps:$4 sm:$0xff]  }
  0x70   : > { %1967 = vmatpush3.bf16.msra.mxu0 %v2188_v3  ;;  %v2193_v17 = vld [vmem:[#allocation5 + $0x30] sm:$0xff]   ;;  %v2210_v18 = vld [vmem:[#allocation7 + $0x40] ss:$8 sps:$4 sm:$0xff]   ;;  %v2194_v20 = vld [vmem:[#allocation5 + $0x38] sm:$0xff]   ;;  %v594_v39 = vsub.s32 1, %v2742_v37  ;;  %vm1511_vm3 = vcmask 1041408  }
  0x71   : > { %1968 = vmatprep.subr.bf16.mxu0 %v2446_v0  ;;  %v2211_v19 = vld [vmem:[#allocation7 + $0x54] ss:$8 sps:$4 sm:$0xff]   ;;  %v2213_v21 = vld [vmem:[#allocation7 + $0x50] ss:$8 sps:$4 sm:$0xff]   ;;  %v2214_v23 = vld [vmem:[#allocation7 + $0x64] ss:$8 sps:$4 sm:$0xff]  }
  0x72   : > { %729 = vmatpush1.bf16.msra.mxu1 %v2201_v9  ;;  %v2195_v22 = vld [vmem:[%s2689_s26] sm:$0xff]   ;;  %v2216_v24 = vld [vmem:[#allocation7 + $0x60] ss:$8 sps:$4 sm:$0xff]   ;;  %s1809_s24 = sshll.u32 %s2685_s29, 4  ;;  %s1893_s19 = sshll.u32 %s2528_s17, 8 }
  0x73   : > { %730 = vmatprep.subr.bf16.mxu1 %v2202_v10  ;;  %v2217_v25 = vld [vmem:[#allocation7 + $0x74] ss:$8 sps:$4 sm:$0xff]   ;;  %v2219_v26 = vld [vmem:[#allocation7 + $0x70] ss:$8 sps:$4 sm:$0xff]   ;;  %v2222_v29 = vld [vmem:[%s2711_s11 + $0x10] sm:$0xff]   ;;  %s422_s23 = scalar_lea.vmem [#allocation8], %s1809_s24  ;;  %s3130_s28 = scalar_lea.hbm %s3184_s10, %s1893_s19 }
  0x74   : > { %1969 = vmatpush3.bf16.msra.mxu0 %v2189_v4  ;;  %v2220_v27 = vld [vmem:[%s2711_s11] sm:$0xff]   ;;  %v2221_v28 = vld [vmem:[%s2711_s11 + $0x8] sm:$0xff]   ;;  %v2223_v30 = vld [vmem:[%s2711_s11 + $0x18] sm:$0xff]   ;;  %s1693_s26 = sshll.u32 %s422_s23, 4  ;;  %p3206_p2 = scmp.ne.s32.totalorder %s3199_s22, 0  ;;  %s3125_s26 = int_to_ptr.vmem [resolvable:$true] %s1693_s26 }
  0x75   : > { %1970 = vmatprep.subr.bf16.mxu0 %v2446_v0  ;;  %v2224_v31 = vld [vmem:[%s2711_s11 + $0x20] sm:$0xff]   ;;  %v2227_v33 = vld [vmem:[%s2711_s11 + $0x28] sm:$0xff]   ;;  %v2230_v34 = vld [vmem:[%s2711_s11 + $0x30] sm:$0xff]   ;;  %s2367_s12 = scalar_lea.vmem %s3125_s26, 256  ;;  %s2449_s17 = smov [#allocation8]  }
  0x76   : > { %731 = vmatpush1.bf16.msra.mxu1 %v2204_v12  ;;  %v2730_v32 = vld [vmem:[%s3182_s8] sm:$0xff]   ;;  %v2233_v35 = vld [vmem:[%s2711_s11 + $0x38] sm:$0xff]   ;;  %v2762_v52 = vld [vmem:[%s3182_s8 + $0x8] sm:$0xff]   ;;  %s1680_s11 = scalar_lea.sflag [#allocation4], %s2685_s29  ;;  %p2368_p0 = scmp.ne.s32.totalorder %s3125_s26, %s2367_s12 }
  0x77   : > { %732 = vmatprep.subr.bf16.mxu1 %v2205_v13  ;;  %v2747_v38 = vld [vmem:[%s3179_s5] sm:$0x3]  ;;  %v2767_v53 = vld [vmem:[%s3182_s8 + $0x10] sm:$0xff]   ;;  %v2237_v56 = vld [vmem:[%s3180_s6 + $0x8] sm:$0xff]   ;;  %s2371_s20 = sshll.u32 %s2449_s17, 4  ;;  %s2372_s20 = int_to_ptr.vmem [resolvable:$false] %s2371_s20 }
  0x78   : > { %1971 = vmatpush3.bf16.msra.mxu0 %v2190_v5  ;;  %v2751_v40 = vrot.slane %v2747_v38, %v594_v39  ;;  %v1812_v41 = vld [vmem:[%s3178_s4] ss:$0 sm:$0xff]  ;;  %v2238_v61 = vld [vmem:[%s3180_s6 + $0x10] sm:$0xff]   ;;  %v2792_v62 = vld [vmem:[%s3182_s8 + $0x18] sm:$0xff]   ;;  %p2369_p3 = pnand %p2368_p0, %p3206_p2  ;;  %s2373_s27 = scalar_lea.vmem %s2372_s20, 512 }
  0x79   : > { %1972 = vmatprep.subr.bf16.mxu0 %v2446_v0  ;;  %v2236_v51 = vld [vmem:[%s3180_s6] sm:$0xff]   ;;  %v2239_v3 = vld [vmem:[%s3180_s6 + $0x18] sm:$0xff]   ;;  %v2822_v9 = vld [vmem:[%s3182_s8 + $0x28] sm:$0xff]   ;;  %p2374_p9 = scmp.lt.s32.totalorder %s3125_s26, %s2372_s20  ;;  %p2375_p12 = scmp.lt.s32.totalorder %s2373_s27, %s2367_s12 }
  0x7a   : > { %733 = vmatpush1.bf16.msra.mxu1 %v2207_v15  ;;  %v2797_v63 = vld [vmem:[%s3182_s8 + $0x20] sm:$0xff]   ;;  %v2827_v10 = vld [vmem:[%s3182_s8 + $0x30] sm:$0xff]   ;;  %v2241_v13 = vld [vmem:[%s3180_s6 + $0x28] sm:$0xff]   ;;  %p2370_p5 = pneg %p2369_p3 }
  0x7b   : > { %734 = vmatprep.subr.bf16.mxu1 %v2208_v16  ;;  %v2240_v8 = vld [vmem:[%s3180_s6 + $0x20] sm:$0xff]   ;;  %p2376_p1 = por %p2375_p12, %p2374_p9 }
  0x7c   : > { %1973 = vmatpush3.bf16.msra.mxu0 %v2191_v11 }
  0x7d   : > { %1974 = vmatprep.subr.bf16.mxu0 %v2446_v0  ;;  %p2377_p13 = pnand %p2376_p1, %p2370_p5 }
  0x7e   : > { %735 = vmatpush1.bf16.msra.mxu1 %v2210_v18  ;;  %v2849_v18 = vld [vmem:[%s3182_s8 + $0x38] sm:$0xff]  }
  0x7f   : > { %736 = vmatprep.subr.bf16.mxu1 %v2211_v19 }
  0x80   : > { %1975 = vmatpush3.bf16.msra.mxu0 %v2192_v14 }
  0x81   : > { %1976 = vmatprep.subr.bf16.mxu0 %v2446_v0 }
  0x82   : > { %737 = vmatpush1.bf16.msra.mxu1 %v2213_v21 }
  0x83   : > { %738 = vmatprep.subr.bf16.mxu1 %v2214_v23 }
  0x84   : > { %1977 = vmatpush3.bf16.msra.mxu0 %v2193_v17 }
  0x85   : > { %1978 = vmatprep.subr.bf16.mxu0 %v2446_v0 }
  0x86   : > { %739 = vmatpush1.bf16.msra.mxu1 %v2216_v24 }
  0x87   : > { %740 = vmatprep.subr.bf16.mxu1 %v2217_v25 }
  0x88   : > { %1979 = vmatpush3.bf16.msra.mxu0 %v2194_v20 }
  0x8a   : > { %741 = vmatpush1.bf16.msra.mxu1 %v2219_v26 }
  0x8b   : > { %1981 = vmatmul.mubr.bf16.vlgmr.msra.gmra.mrb[0].mxu0 %v2195_v22  ;;  %2034 = vmatprep.subr.bf16.mxu1 %v2446_v0 }
  0x8c   : > { %1986 = vmatprep.mubr.msk.bf16.mxu0 %vm896_vm1, %v2730_v32 }
  0x8d   : > { %759 = vmatmul.mubr.bf16.vlgmr.msra.gmra.mrb[0].mxu1 %v2220_v27 }
  0x8e   : > { %768 = vmatprep.mubr.bf16.mxu1 %v2448_v1 }
  0x95   : > { %769 = vmatmul.mubr.bf16.gmra.mrb[4].mxu1 %v2221_v28 }
  0x96   : > { %778 = vmatprep.mubr.bf16.mxu1 %v2448_v1 }
  0x9d   : > { %779 = vmatmul.mubr.bf16.gmra.mrb[8].mxu1 %v2222_v29  ;;  %v2242_v29 = vld [vmem:[%s3180_s6 + $0x30] sm:$0xff]  }
  0x9e   : > { %788 = vmatprep.mubr.bf16.mxu1 %v2448_v1 }
  0xa5   : > { %789 = vmatmul.mubr.bf16.gmra.mrb[12].mxu1 %v2223_v30 }
  0xa6   : > { %798 = vmatprep.mubr.bf16.mxu1 %v2448_v1 }
  0xad   : > { %799 = vmatmul.mubr.bf16.gmra.mrb[16].mxu1 %v2224_v31 }
  0xae   : > { %808 = vmatprep.mubr.bf16.mxu1 %v2448_v1 }
  0xb5   : > { %809 = vmatmul.mubr.bf16.gmra.mrb[20].mxu1 %v2227_v33  ;;  %v2243_v33 = vld [vmem:[%s3180_s6 + $0x38] sm:$0xff]  }
  0xb6   : > { %818 = vmatprep.mubr.bf16.mxu1 %v2448_v1 }
  0xbd   : > { %819 = vmatmul.mubr.bf16.gmra.mrb[24].mxu1 %v2230_v34 }
  0xbe   : > { %828 = vmatprep.mubr.bf16.mxu1 %v2448_v1 }
  0xc5   : > { %829 = vmatmul.mubr.bf16.gmra.mrb[28].mxu1 %v2233_v35 }
  0xc6   : > { %2050 = vmatprep.mubr.msk.bf16.mxu1 %vm2447_vm0, %v2446_v0 }
 0x15e   : > { %v545_v42 = vpop.f32.mrb[0].mxu0 }
 0x15f   : > { %v546_v43 = vadd.f32 %v1812_v41, %v545_v42  ;;  %v1982_v44 = vpop.f32.mrb[1].mxu0 }
 0x160   : > { %v548_v45 = vpop.f32.mrb[2].mxu0  ;;  %v2769_v54 = vpop.f32.mrb[0].mxu1 }
 0x161   : > { %v549_v46 = vadd.f32 %v1812_v41, %v548_v45  ;;  %v1983_v47 = vpop.f32.mrb[3].mxu0  ;;  %v552_v48 = vmul.f32 0.17677669, %v546_v43  ;;  %v762_v55 = vpop.f32.mrb[1].mxu1 }
 0x162   : > { %v2775_v57 = vadd.f32 %v762_v55, %v2751_v40  ;;  %v2777_v58 = vpop.f32.mrb[2].mxu1 }
 0x163   : > { %v553_v49 = vmul.f32 0.17677669, %v549_v46  ;;  %v766_v59 = vpop.f32.mrb[3].mxu1 }
 0x164   : > { %v2784_v60 = vadd.f32 %v766_v59, %v2751_v40 }
 0x165   : > { %v855_v50 = vpack.c.bf16 %v553_v49, %v552_v48 }
 0x167   : > { %1984 = vmatprep.subr.bf16.mxu0 %v855_v50 }
 0x168   : > { %1985 = vmatpush3.bf16.msra.mxu0 %v855_v50  ;;  %v2799_v1 = vpop.f32.mrb[4].mxu1 }
 0x169   : > { %2002 = vmatprep.subr.bf16.mxu0 %v2236_v51  ;;  %v772_v2 = vpop.f32.mrb[5].mxu1 }
 0x16a   : > { %v2805_v4 = vadd.f32 %v772_v2, %v2751_v40  ;;  %v2807_v5 = vpop.f32.mrb[6].mxu1 }
 0x16b   : > { %1987 = vmatmul.mubr.msk.bf16.vlgmr.msra.gmra.mrb[4].mxu0 %vm896_vm1, %v2762_v52  ;;  %v776_v6 = vpop.f32.mrb[7].mxu1 }
 0x16c   : > { %1990 = vmatprep.mubr.msk.bf16.mxu0 %vm896_vm1, %v2767_v53  ;;  %2003 = vmatpush3.bf16.msra.mxu0 %v2236_v51  ;;  %v2814_v7 = vadd.f32 %v776_v6, %v2751_v40 }
 0x16d   : > { %2004 = vmatprep.subr.bf16.mxu0 %v2237_v56 }
 0x170   : > { %2005 = vmatpush3.bf16.msra.mxu0 %v2237_v56  ;;  %v2829_v11 = vpop.f32.mrb[8].mxu1 }
 0x171   : > { %2006 = vmatprep.subr.bf16.mxu0 %v2238_v61  ;;  %v782_v12 = vpop.f32.mrb[9].mxu1 }
 0x172   : > { %v2835_v14 = vadd.f32 %v782_v12, %v2751_v40  ;;  %v2837_v15 = vpop.f32.mrb[10].mxu1 }
 0x173   : > { %1991 = vmatmul.mubr.msk.bf16.gmra.mrb[8].mxu0 %vm896_vm1, %v2792_v62  ;;  %v786_v16 = vpop.f32.mrb[11].mxu1 }
 0x174   : > { %1994 = vmatprep.mubr.msk.bf16.mxu0 %vm896_vm1, %v2797_v63  ;;  %2007 = vmatpush3.bf16.msra.mxu0 %v2238_v61  ;;  %v2844_v17 = vadd.f32 %v786_v16, %v2751_v40  ;;  %v590_v61 = vsub.s32 0, %v2742_v37 }
 0x175   : > { %2008 = vmatprep.subr.bf16.mxu0 %v2239_v3 }
 0x176   : > { %v591_v2 = vrot.slane %v2747_v38, %v590_v61 }
 0x178   : > { %2009 = vmatpush3.bf16.msra.mxu0 %v2239_v3  ;;  %v790_v19 = vpop.f32.mrb[12].mxu1  ;;  %v771_v3 = vadd.f32 %v2799_v1, %v591_v2  ;;  %v761_v6 = vadd.f32 %v2769_v54, %v591_v2  ;;  %v775_v12 = vadd.f32 %v2807_v5, %v591_v2  ;;  %v781_v38 = vadd.f32 %v2829_v11, %v591_v2 }
 0x179   : > { %2010 = vmatprep.subr.bf16.mxu0 %v2240_v8  ;;  %v792_v20 = vpop.f32.mrb[13].mxu1  ;;  %v785_v5 = vadd.f32 %v2837_v15, %v591_v2 }
 0x17a   : > { %v2854_v21 = vadd.f32 %v792_v20, %v2751_v40  ;;  %v794_v22 = vpop.f32.mrb[14].mxu1  ;;  %v765_v20 = vadd.f32 %v2777_v58, %v591_v2 }
 0x17b   : > { %1995 = vmatmul.mubr.msk.bf16.gmra.mrb[12].mxu0 %vm896_vm1, %v2822_v9  ;;  %v796_v23 = vpop.f32.mrb[15].mxu1  ;;  %v795_v54 = vadd.f32 %v794_v22, %v591_v2 }
 0x17c   : > { %1998 = vmatprep.mubr.msk.bf16.mxu0 %vm896_vm1, %v2827_v10  ;;  %2011 = vmatpush3.bf16.msra.mxu0 %v2240_v8  ;;  %v2857_v24 = vadd.f32 %v796_v23, %v2751_v40 }
 0x17d   : > { %2012 = vmatprep.subr.bf16.mxu0 %v2241_v13 }
 0x180   : > { %2013 = vmatpush3.bf16.msra.mxu0 %v2241_v13  ;;  %v2859_v25 = vpop.f32.mrb[16].mxu1 }
 0x181   : > { %v802_v26 = vpop.f32.mrb[17].mxu1  ;;  %2014 = vmatprep.subr.bf16.mxu0 %v2242_v29 }
 0x182   : > { %v2862_v27 = vadd.f32 %v802_v26, %v2751_v40  ;;  %v2864_v28 = vpop.f32.mrb[18].mxu1 }
 0x183   : > { %1999 = vmatmul.mubr.msk.bf16.gmra.mrb[16].mxu0 %vm896_vm1, %v2849_v18  ;;  %v806_v30 = vpop.f32.mrb[19].mxu1 }
 0x184   : > { %v2870_v31 = vadd.f32 %v806_v30, %v2751_v40  ;;  %2015 = vmatpush3.bf16.msra.mxu0 %v2242_v29 }
 0x185   : > { %2016 = vmatprep.subr.bf16.mxu0 %v2243_v33 }
 0x188   : > { %v810_v34 = vpop.f32.mrb[20].mxu1  ;;  %2017 = vmatpush3.bf16.msra.mxu0 %v2243_v33 }
 0x189   : > { %v812_v35 = vpop.f32.mrb[21].mxu1 }
 0x18a   : > { %v2876_v36 = vadd.f32 %v812_v35, %v2751_v40  ;;  %v814_v39 = vpop.f32.mrb[22].mxu1  ;;  %v791_v35 = vadd.f32 %v790_v19, %v591_v2  ;;  %v801_v19 = vadd.f32 %v2859_v25, %v591_v2 }
 0x18b   : > { %v816_v41 = vpop.f32.mrb[23].mxu1  ;;  %v815_v11 = vadd.f32 %v814_v39, %v591_v2 }
 0x18c   : > { %v2879_v42 = vadd.f32 %v816_v41, %v2751_v40 }
 0x190   : > { %v820_v43 = vpop.f32.mrb[24].mxu1 }
 0x191   : > { %v822_v44 = vpop.f32.mrb[25].mxu1 }
 0x192   : > { %v2882_v45 = vadd.f32 %v822_v44, %v2751_v40  ;;  %v2884_v46 = vpop.f32.mrb[26].mxu1 }
 0x193   : > { %v826_v47 = vpop.f32.mrb[27].mxu1  ;;  %v825_v39 = vadd.f32 %v2884_v46, %v591_v2 }
 0x194   : > { %v2887_v48 = vadd.f32 %v826_v47, %v2751_v40 }
 0x198   : > { %v830_v49 = vpop.f32.mrb[28].mxu1 }
 0x199   : > { %v832_v50 = vpop.f32.mrb[29].mxu1 }
 0x19a   : > { %v2890_v51 = vadd.f32 %v832_v50, %v2751_v40  ;;  %v834_v55 = vpop.f32.mrb[30].mxu1 }
 0x19b   : > { %v836_v56 = vpop.f32.mrb[31].mxu1 }
 0x19c   : > { %v2893_v59 = vadd.f32 %v836_v56, %v2751_v40 }
 0x23e   : > { %v1988_v8 = vpop.f32.mrb[4].mxu0 }
 0x23f   : > { %v1020_v13 = vmul.f32 %v1988_v8, %v771_v3  ;;  %v955_v16 = vpop.f32.mrb[5].mxu0  ;;  %v811_v8 = vadd.f32 %v810_v34, %v591_v2  ;;  %v821_v34 = vadd.f32 %v820_v43, %v591_v2 }
 0x240   : > { %v1018_v23 = vmul.f32 %v955_v16, %v761_v6  ;;  %v1989_v26 = vpop.f32.mrb[6].mxu0  ;;  %v805_v16 = vadd.f32 %v2864_v28, %v591_v2 }
 0x241   : > { %v1021_v29 = vmul.f32 %v1989_v26, %v775_v12  ;;  %v958_v40 = vpop.f32.mrb[7].mxu0 }
 0x242   : > { %v1019_v30 = vmul.f32 %v958_v40, %v765_v20 }
 0x243   : > { %v1035_v33 = vpack.c.bf16 %v1021_v29, %v1020_v13 }
 0x244   : > { %v1034_v37 = vpack.c.bf16 %v1019_v30, %v1018_v23  ;;  %v831_v30 = vadd.f32 %v830_v49, %v591_v2 }
 0x246   : > { %v1992_v1 = vpop.f32.mrb[8].mxu0  ;;  %2018 = vmatprep.mubr.bf16.mxu0 %v1034_v37  ;;  %v835_v37 = vadd.f32 %v834_v55, %v591_v2 }
 0x247   : > { %v1024_v41 = vmul.f32 %v1992_v1, %v791_v35  ;;  %v971_v44 = vpop.f32.mrb[9].mxu0  ;;  %2019 = vmatmul.mubr.bf16.vlgmr.msra.gmra.mrb[20].mxu0 %v1035_v33 }
 0x248   : > { %v1022_v47 = vmul.f32 %v971_v44, %v781_v38  ;;  %v1993_v58 = vpop.f32.mrb[10].mxu0 }
 0x249   : > { %v1025_v50 = vmul.f32 %v1993_v58, %v795_v54  ;;  %v974_v56 = vpop.f32.mrb[11].mxu0 }
 0x24a   : > { %v1023_v61 = vmul.f32 %v974_v56, %v785_v5 }
 0x24b   : > { %v1037_v3 = vpack.c.bf16 %v1025_v50, %v1024_v41 }
 0x24c   : > { %v1036_v6 = vpack.c.bf16 %v1023_v61, %v1022_v47 }
 0x24e   : > { %v1996_v12 = vpop.f32.mrb[12].mxu0  ;;  %2022 = vmatprep.mubr.bf16.mxu0 %v1036_v6 }
 0x24f   : > { %v1028_v13 = vmul.f32 %v1996_v12, %v811_v8  ;;  %v987_v22 = vpop.f32.mrb[13].mxu0  ;;  %2023 = vmatmul.mubr.bf16.gmra.mrb[24].mxu0 %v1037_v3 }
 0x250   : > { %v1026_v20 = vmul.f32 %v987_v22, %v801_v19  ;;  %v1997_v15 = vpop.f32.mrb[14].mxu0 }
 0x251   : > { %v1029_v23 = vmul.f32 %v1997_v15, %v815_v11  ;;  %v990_v26 = vpop.f32.mrb[15].mxu0 }
 0x252   : > { %v1027_v29 = vmul.f32 %v990_v26, %v805_v16 }
 0x253   : > { %v1039_v40 = vpack.c.bf16 %v1029_v23, %v1028_v13 }
 0x254   : > { %v1038_v33 = vpack.c.bf16 %v1027_v29, %v1026_v20 }
 0x256   : > { %v2000_v35 = vpop.f32.mrb[16].mxu0  ;;  %2026 = vmatprep.mubr.bf16.mxu0 %v1038_v33 }
 0x257   : > { %v1032_v25 = vmul.f32 %v2000_v35, %v831_v30  ;;  %v1003_v38 = vpop.f32.mrb[17].mxu0  ;;  %2027 = vmatmul.mubr.bf16.gmra.mrb[28].mxu0 %v1039_v40 }
 0x258   : > { %v1030_v1 = vmul.f32 %v1003_v38, %v821_v34  ;;  %v2001_v54 = vpop.f32.mrb[18].mxu0 }
 0x259   : > { %v1033_v28 = vmul.f32 %v2001_v54, %v835_v37  ;;  %v1006_v41 = vpop.f32.mrb[19].mxu0 }
 0x25a   : > { %v1031_v44 = vmul.f32 %v1006_v41, %v825_v39 }
 0x25b   : > { %v1041_v5 = vpack.c.bf16 %v1033_v28, %v1032_v25 }
 0x25c   : > { %v1040_v47 = vpack.c.bf16 %v1031_v44, %v1030_v1 }
 0x25e   : > { %2030 = vmatprep.mubr.bf16.mxu0 %v1040_v47 }
 0x25f   : > { %2031 = vmatmul.mubr.bf16.gmra.mrb[32].mxu0 %v1041_v5 }
 0x260   : > { %2056 = vmatprep.mubr.msk.bf16.mxu0 %vm896_vm1, %v2730_v32 }
 0x31a   : > { %v2908_v43 = vpop.f32.mrb[20].mxu0 }
 0x31b   : > { %v1140_v49 = vpop.f32.mrb[21].mxu0  ;;  %v1206_v2 = vsel %vm1203_vm2, %v2908_v43, -inf }
 0x31c   : > { %v2910_v55 = vpop.f32.mrb[22].mxu0  ;;  %v1204_v61 = vsel %vm1203_vm2, %v1140_v49, -inf }
 0x31d   : > { %v1143_v58 = vpop.f32.mrb[23].mxu0  ;;  %v1207_v8 = vsel %vm1203_vm2, %v2910_v55, -inf }
 0x31e   : > { %v1205_v13 = vsel %vm1203_vm2, %v1143_v58, -inf }
 0x322   : > { %v2912_v46 = vpop.f32.mrb[24].mxu0 }
 0x323   : > { %v1212_v50 = vsel %vm1203_vm2, %v2912_v46, -inf  ;;  %v2918_v56 = vpop.f32.mrb[25].mxu0 }
 0x324   : > { %v1213_v32 = vmax.f32 %v1206_v2, %v1212_v50  ;;  %v1208_v3 = vsel %vm1203_vm2, %v2918_v56, -inf  ;;  %v2923_v6 = vpop.f32.mrb[26].mxu0 }
 0x325   : > { %v1209_v19 = vmax.f32 %v1204_v61, %v1208_v3  ;;  %v1214_v12 = vsel %vm1203_vm2, %v2923_v6, -inf  ;;  %v1159_v11 = vpop.f32.mrb[27].mxu0 }
 0x326   : > { %v1215_v22 = vmax.f32 %v1207_v8, %v1214_v12  ;;  %v1210_v16 = vsel %vm1203_vm2, %v1159_v11, -inf }
 0x327   : > { %v1211_v20 = vmax.f32 %v1205_v13, %v1210_v16 }
 0x32a   : > { %v2931_v15 = vpop.f32.mrb[28].mxu0 }
 0x32b   : > { %v1220_v23 = vsel %vm1203_vm2, %v2931_v15, -inf  ;;  %v2935_v26 = vpop.f32.mrb[29].mxu0 }
 0x32c   : > { %v1221_v29 = vmax.f32 %v1213_v32, %v1220_v23  ;;  %v1216_v40 = vsel %vm1203_vm2, %v2935_v26, -inf  ;;  %v2939_v30 = vpop.f32.mrb[30].mxu0 }
 0x32d   : > { %v1217_v33 = vmax.f32 %v1209_v19, %v1216_v40  ;;  %v1222_v37 = vsel %vm1203_vm2, %v2939_v30, -inf  ;;  %v2943_v34 = vpop.f32.mrb[31].mxu0 }
 0x32e   : > { %v1223_v35 = vmax.f32 %v1215_v22, %v1222_v37  ;;  %v1218_v25 = vsel %vm1203_vm2, %v2943_v34, -inf }
 0x32f   : > { %v1219_v38 = vmax.f32 %v1211_v20, %v1218_v25 }
 0x332   : > { %v2947_v39 = vpop.f32.mrb[32].mxu0 }
 0x333   : > { %v1228_v1 = vsel %vm1203_vm2, %v2947_v39, -inf  ;;  %v2951_v54 = vpop.f32.mrb[33].mxu0 }
 0x334   : > { %v1229_v28 = vmax.f32 %v1221_v29, %v1228_v1  ;;  %v1224_v41 = vsel %vm1203_vm2, %v2951_v54, -inf  ;;  %v2955_v44 = vpop.f32.mrb[34].mxu0 }
 0x335   : > { %v1225_v5 = vmax.f32 %v1217_v33, %v1224_v41  ;;  %v1230_v47 = vsel %vm1203_vm2, %v2955_v44, -inf  ;;  %v2959_v2 = vpop.f32.mrb[35].mxu0 }
 0x336   : > { %v1231_v50 = vmax.f32 %v1223_v35, %v1230_v47  ;;  %v1226_v61 = vsel %vm1203_vm2, %v2959_v2, -inf }
 0x337   : > { %v1227_v32 = vmax.f32 %v1219_v38, %v1226_v61 }
 0x338   : > { %v1233_v3 = vmax.f32 %v1229_v28, %v1231_v50 }
 0x339   : > { %v1232_v8 = vmax.f32 %v1225_v5, %v1227_v32 }
 0x33b   : > { %v1234_v19 = vmax.f32 %v1232_v8, %v1233_v3 }
 0x33d   : > { %v1235_v12 = vrot.slane %v1234_v19, 4 }
 0x33f   : > { %v1236_v13 = vmax.f32 %v1234_v19, %v1235_v12 }
 0x341   : > { %v1237_v22 = vrot.slane %v1236_v13, 2 }
 0x343   : > { %v1238_v16 = vmax.f32 %v1236_v13, %v1237_v22 }
 0x345   : > { %v1239_v20 = vrot.slane %v1238_v16, 1 }
 0x347   : > { %v2963_v23 = vmax.f32 %v1238_v16, %v1239_v20 }
 0x349   : > { %v1254_v29 = vsub.f32 %v2959_v2, %v2963_v23  ;;  %v1241_v40 = vsub.f32 %v1140_v49, %v2963_v23  ;;  %v1242_v33 = vsub.f32 %v1143_v58, %v2963_v23  ;;  %v1243_v37 = vsub.f32 %v2908_v43, %v2963_v23 }
 0x34a   : > { %v1244_v35 = vsub.f32 %v2910_v55, %v2963_v23  ;;  %v1245_v25 = vsub.f32 %v2918_v56, %v2963_v23  ;;  %v1246_v38 = vsub.f32 %v1159_v11, %v2963_v23  ;;  %v1247_v1 = vsub.f32 %v2912_v46, %v2963_v23 }
 0x34b   : > { %v1257_v28 = vmax.f32 %v1241_v40, -80.0  ;;  %v1258_v41 = vmax.f32 %v1242_v33, -80.0  ;;  %v1259_v5 = vmax.f32 %v1243_v37, -80.0  ;;  %v1248_v58 = vsub.f32 %v2923_v6, %v2963_v23 }
 0x34c   : > { %v1260_v49 = vmax.f32 %v1244_v35, -80.0  ;;  %v1249_v55 = vsub.f32 %v2935_v26, %v2963_v23  ;;  %v1261_v50 = vmax.f32 %v1245_v25, -80.0  ;;  %v1262_v56 = vmax.f32 %v1246_v38, -80.0 }
 0x34d   : > { %v1273_v47 = vmul.f32 1.442695, %v1257_v28  ;;  %v1275_v43 = vmul.f32 1.442695, %v1258_v41  ;;  %v1277_v2 = vmul.f32 1.442695, %v1259_v5  ;;  %v1250_v11 = vsub.f32 %v2943_v34, %v2963_v23 }
 0x34e   : > { %v1279_v61 = vmul.f32 1.442695, %v1260_v49  ;;  %v1251_v46 = vsub.f32 %v2931_v15, %v2963_v23  ;;  %v1252_v6 = vsub.f32 %v2939_v30, %v2963_v23  ;;  %v1281_v32 = vmul.f32 1.442695, %v1261_v50 }
 0x34f   : > { %2245 = vpow2.f32 %v1273_v47  ;;  %v1283_v3 = vmul.f32 1.442695, %v1262_v56  ;;  %v1263_v8 = vmax.f32 %v1247_v1, -80.0  ;;  %v1264_v26 = vmax.f32 %v1248_v58, -80.0 }
 0x350   : > { %2247 = vpow2.f32 %v1275_v43  ;;  %v1253_v19 = vsub.f32 %v2951_v54, %v2963_v23  ;;  %v1255_v34 = vsub.f32 %v2947_v39, %v2963_v23  ;;  %v1256_v12 = vsub.f32 %v2955_v44, %v2963_v23 }
 0x351   : > { %2249 = vpow2.f32 %v1277_v2  ;;  %v1285_v15 = vmul.f32 1.442695, %v1263_v8  ;;  %v1265_v13 = vmax.f32 %v1249_v55, -80.0  ;;  %v1287_v30 = vmul.f32 1.442695, %v1264_v26 }
 0x352   : > { %2251 = vpow2.f32 %v1279_v61  ;;  %v1266_v22 = vmax.f32 %v1250_v11, -80.0  ;;  %v1267_v40 = vmax.f32 %v1251_v46, -80.0  ;;  %v1268_v37 = vmax.f32 %v1252_v6, -80.0 }
 0x353   : > { %2253 = vpow2.f32 %v1281_v32  ;;  %v1289_v20 = vmul.f32 1.442695, %v1265_v13  ;;  %v1270_v35 = vmax.f32 %v1254_v29, -80.0  ;;  %v1269_v1 = vmax.f32 %v1253_v19, -80.0 }
 0x354   : > { %2255 = vpow2.f32 %v1283_v3  ;;  %v1291_v54 = vmul.f32 1.442695, %v1266_v22  ;;  %v1293_v25 = vmul.f32 1.442695, %v1267_v40  ;;  %v1295_v38 = vmul.f32 1.442695, %v1268_v37 }
 0x355   : > { %2257 = vpow2.f32 %v1285_v15  ;;  %v1299_v49 = vmul.f32 1.442695, %v1270_v35  ;;  %v1271_v58 = vmax.f32 %v1255_v34, -80.0  ;;  %v1297_v29 = vmul.f32 1.442695, %v1269_v1 }
 0x356   : > { %2259 = vpow2.f32 %v1287_v30  ;;  %v1272_v47 = vmax.f32 %v1256_v12, -80.0  ;;  %v3052_v30 = vld [vmem:[%s3183_s9] sm:$0xff]  }
 0x357   : > { %2261 = vpow2.f32 %v1289_v20  ;;  %v1301_v50 = vmul.f32 1.442695, %v1271_v58 }
 0x358   : > { %2263 = vpow2.f32 %v1291_v54  ;;  %v1303_v56 = vmul.f32 1.442695, %v1272_v47 }
 0x359   : > { %v2994_v16 = vpop.eup %2245  ;;  %2265 = vpow2.f32 %v1293_v25 }
 0x35a   : > { %v2996_v33 = vpop.eup %2247  ;;  %2267 = vpow2.f32 %v1295_v38 }
 0x35b   : > { %v2998_v39 = vpop.eup %2249  ;;  %v1307_v44 = vpack.c.bf16 %v2996_v33, %v2994_v16  ;;  %2269 = vpow2.f32 %v1299_v49 }
 0x35c   : > { %v3002_v23 = vpop.eup %2251  ;;  %2271 = vpow2.f32 %v1297_v29 }
 0x35d   : > { %2035 = vmatpush3.bf16.msra.mxu1 %v1307_v44  ;;  %v3005_v28 = vpop.eup %2253  ;;  %v1308_v41 = vpack.c.bf16 %v3002_v23, %v2998_v39  ;;  %2273 = vpow2.f32 %v1301_v50 }
 0x35e   : > { %2036 = vmatprep.subr.bf16.mxu1 %v2446_v0  ;;  %v3009_v5 = vpop.eup %2255  ;;  %2275 = vpow2.f32 %v1303_v56 }
 0x35f   : > { %v3012_v43 = vpop.eup %2257  ;;  %v1309_v55 = vpack.c.bf16 %v3009_v5, %v3005_v28 }
 0x360   : > { %v3016_v2 = vpop.eup %2259 }
 0x361   : > { %2037 = vmatpush3.bf16.msra.mxu1 %v1308_v41  ;;  %v3019_v11 = vpop.eup %2261  ;;  %v1310_v61 = vpack.c.bf16 %v3016_v2, %v3012_v43 }
 0x362   : > { %2038 = vmatprep.subr.bf16.mxu1 %v2446_v0  ;;  %v3023_v46 = vpop.eup %2263 }
 0x363   : > { %v3026_v6 = vpop.eup %2265  ;;  %v1311_v32 = vpack.c.bf16 %v3023_v46, %v3019_v11 }
 0x364   : > { %v3030_v3 = vpop.eup %2267 }
 0x365   : > { %2039 = vmatpush3.bf16.msra.mxu1 %v1309_v55  ;;  %v3033_v8 = vpop.eup %2269  ;;  %v1312_v26 = vpack.c.bf16 %v3030_v3, %v3026_v6 }
 0x366   : > { %2040 = vmatprep.subr.bf16.mxu1 %v2446_v0  ;;  %v3037_v19 = vpop.eup %2271 }
 0x367   : > { %v3040_v34 = vpop.eup %2273  ;;  %v1313_v12 = vpack.c.bf16 %v3033_v8, %v3037_v19 }
 0x368   : > { %v3044_v15 = vpop.eup %2275 }
 0x369   : > { %2041 = vmatpush3.bf16.msra.mxu1 %v1310_v61  ;;  %v1314_v13 = vpack.c.bf16 %v3044_v15, %v3040_v34 }
 0x36a   : > { %2042 = vmatprep.subr.bf16.mxu1 %v2446_v0 }
 0x36d   : > { %2043 = vmatpush3.bf16.msra.mxu1 %v1311_v32 }
 0x36e   : > { %2044 = vmatprep.subr.bf16.mxu1 %v2446_v0 }
 0x371   : > { %2045 = vmatpush3.bf16.msra.mxu1 %v1312_v26 }
 0x372   : > { %2046 = vmatprep.subr.bf16.mxu1 %v2446_v0 }
 0x375   : > { %2047 = vmatpush3.bf16.msra.mxu1 %v1313_v12 }
 0x376   : > { %2048 = vmatprep.subr.bf16.mxu1 %v2446_v0 }
 0x379   : > { %2049 = vmatpush3.bf16.msra.mxu1 %v1314_v13 }
 0x37c   : > { %2051 = vmatmul.mubr.bf16.vlgmr.msra.gmra.mrb[32].mxu1 %v3052_v30 }
 0x44f   : > { %v1355_v22 = vpop.f32.mrb[32].mxu1 }
 0x450   : > { %v1356_v20 = vadd.f32 1e-30, %v1355_v22  ;;  %v2052_v40 = vpop.f32.mrb[33].mxu1 }
 0x451   : > { %v1358_v54 = vpop.f32.mrb[34].mxu1 }
 0x452   : > { %v1359_v37 = vadd.f32 1e-30, %v1358_v54  ;;  %v2053_v44 = vpop.f32.mrb[35].mxu1  ;;  %2277 = vrcp.f32 %v1356_v20 }
 0x454   : > { %2279 = vrcp.f32 %v1359_v37 }
 0x45c   : > { %v2278_v35 = vpop.eup %2277 }
 0x45e   : > { %v2280_v25 = vpop.eup %2279 }
 0x45f   : > { %v1364_v38 = vpack.c.bf16 %v2280_v25, %v2278_v35 }
 0x461   : > { %2054 = vmatprep.subr.bf16.mxu0 %v1364_v38 }
 0x462   : > { %2055 = vmatpush3.bf16.msra.mxu0 %v1364_v38 }
 0x463   : > { %2090 = vmatprep.subr.bf16.mxu0 %v2446_v0 }
 0x465   : > { %2057 = vmatmul.mubr.msk.bf16.vlgmr.msra.gmra.mrb[36].mxu0 %vm896_vm1, %v2762_v52  ;;  %v1486_v52 = vld [vmem:[%s3181_s7] sm:$0x3] }
 0x466   : > { %2060 = vmatprep.mubr.msk.bf16.mxu0 %vm896_vm1, %v2767_v53  ;;  %2110 = vmatprep.subr.msk.bf16.mxu1 %vm1511_vm3, %v1486_v52  ;;  %v1513_v53 = vsel %vm1511_vm3, %v1486_v52, 0 }
 0x467   : > { %2073 = vmatpush3.bf16.msra.mxu1 %v1513_v53 }
 0x46d   : > { %2061 = vmatmul.mubr.msk.bf16.gmra.mrb[40].mxu0 %vm896_vm1, %v2792_v62 }
 0x46e   : > { %2064 = vmatprep.mubr.msk.bf16.mxu0 %vm896_vm1, %v2797_v63 }
 0x475   : > { %2065 = vmatmul.mubr.msk.bf16.gmra.mrb[44].mxu0 %vm896_vm1, %v2822_v9 }
 0x476   : > { %2068 = vmatprep.mubr.msk.bf16.mxu0 %vm896_vm1, %v2827_v10 }
 0x47d   : > { %2069 = vmatmul.mubr.msk.bf16.gmra.mrb[48].mxu0 %vm896_vm1, %v2849_v18 }
 0x47e   : > { %2106 = vmatprep.mubr.msk.bf16.mxu0 %vm2447_vm0, %v2446_v0 }
 0x538   : > { %v2058_v62 = vpop.f32.mrb[36].mxu0 }
 0x539   : > { %v1399_v63 = vpop.f32.mrb[37].mxu0  ;;  %v1464_v1 = vmul.f32 %v2998_v39, %v2058_v62 }
 0x53a   : > { %v2059_v9 = vpop.f32.mrb[38].mxu0  ;;  %v1462_v18 = vmul.f32 %v2994_v16, %v1399_v63 }
 0x53b   : > { %v1465_v10 = vmul.f32 %v3002_v23, %v2059_v9  ;;  %v1402_v41 = vpop.f32.mrb[39].mxu0 }
 0x53c   : > { %v1463_v49 = vmul.f32 %v2996_v33, %v1402_v41 }
 0x53d   : > { %v1479_v58 = vpack.c.bf16 %v1465_v10, %v1464_v1 }
 0x53e   : > { %v1478_v29 = vpack.c.bf16 %v1463_v49, %v1462_v18 }
 0x540   : > { %v2062_v47 = vpop.f32.mrb[40].mxu0  ;;  %2074 = vmatprep.mubr.msk.bf16.mxu1 %vm1203_vm2, %v1478_v29 }
 0x541   : > { %v1415_v55 = vpop.f32.mrb[41].mxu0  ;;  %2075 = vmatmul.mubr.msk.bf16.vlgmr.msra.gmra.mrb[36].mxu1 %vm1203_vm2, %v1479_v58  ;;  %v1468_v56 = vmul.f32 %v3012_v43, %v2062_v47 }
 0x542   : > { %v2063_v50 = vpop.f32.mrb[42].mxu0  ;;  %v1466_v23 = vmul.f32 %v3005_v28, %v1415_v55 }
 0x543   : > { %v1469_v39 = vmul.f32 %v3016_v2, %v2063_v50  ;;  %v1418_v61 = vpop.f32.mrb[43].mxu0 }
 0x544   : > { %v1467_v16 = vmul.f32 %v3009_v5, %v1418_v61 }
 0x545   : > { %v1481_v32 = vpack.c.bf16 %v1469_v39, %v1468_v56 }
 0x546   : > { %v1480_v33 = vpack.c.bf16 %v1467_v16, %v1466_v23 }
 0x548   : > { %v2066_v26 = vpop.f32.mrb[44].mxu0  ;;  %2078 = vmatprep.mubr.msk.bf16.mxu1 %vm1203_vm2, %v1480_v33 }
 0x549   : > { %v1431_v12 = vpop.f32.mrb[45].mxu0  ;;  %2079 = vmatmul.mubr.msk.bf16.gmra.mrb[40].mxu1 %vm1203_vm2, %v1481_v32  ;;  %v1472_v22 = vmul.f32 %v3026_v6, %v2066_v26 }
 0x54a   : > { %v2067_v13 = vpop.f32.mrb[46].mxu0  ;;  %v1470_v2 = vmul.f32 %v3019_v11, %v1431_v12 }
 0x54b   : > { %v1473_v43 = vmul.f32 %v3030_v3, %v2067_v13  ;;  %v1434_v20 = vpop.f32.mrb[47].mxu0 }
 0x54c   : > { %v1471_v28 = vmul.f32 %v3023_v46, %v1434_v20 }
 0x54d   : > { %v1483_v40 = vpack.c.bf16 %v1473_v43, %v1472_v22 }
 0x54e   : > { %v1482_v5 = vpack.c.bf16 %v1471_v28, %v1470_v2 }
 0x550   : > { %v2070_v54 = vpop.f32.mrb[48].mxu0  ;;  %2082 = vmatprep.mubr.msk.bf16.mxu1 %vm1203_vm2, %v1482_v5 }
 0x551   : > { %v1447_v37 = vpop.f32.mrb[49].mxu0  ;;  %2083 = vmatmul.mubr.msk.bf16.gmra.mrb[44].mxu1 %vm1203_vm2, %v1483_v40  ;;  %v1476_v35 = vmul.f32 %v3040_v34, %v2070_v54 }
 0x552   : > { %v2071_v44 = vpop.f32.mrb[50].mxu0  ;;  %v1474_v3 = vmul.f32 %v3037_v19, %v1447_v37 }
 0x553   : > { %v1477_v6 = vmul.f32 %v3044_v15, %v2071_v44  ;;  %v1450_v25 = vpop.f32.mrb[51].mxu0 }
 0x554   : > { %v1475_v11 = vmul.f32 %v3033_v8, %v1450_v25 }
 0x555   : > { %v1485_v38 = vpack.c.bf16 %v1477_v6, %v1476_v35 }
 0x556   : > { %v1484_v46 = vpack.c.bf16 %v1475_v11, %v1474_v3 }
 0x558   : > { %2086 = vmatprep.mubr.msk.bf16.mxu1 %vm1203_vm2, %v1484_v46 }
 0x559   : > { %2087 = vmatmul.mubr.msk.bf16.gmra.mrb[48].mxu1 %vm1203_vm2, %v1485_v38 }
 0x614   : > { %v2076_v52 = vpop.f32.mrb[36].mxu1 }
 0x615   : > { %v1614_v53 = vmul.f32 %v2076_v52, %v2805_v4  ;;  %v1549_v62 = vpop.f32.mrb[37].mxu1 }
 0x616   : > { %v1612_v63 = vmul.f32 %v1549_v62, %v2775_v57  ;;  %v2077_v34 = vpop.f32.mrb[38].mxu1 }
 0x617   : > { %v1615_v15 = vmul.f32 %v2077_v34, %v2814_v7  ;;  %v1552_v9 = vpop.f32.mrb[39].mxu1 }
 0x618   : > { %v1613_v19 = vmul.f32 %v1552_v9, %v2784_v60 }
 0x619   : > { %v1629_v1 = vpack.c.bf16 %v1615_v15, %v1614_v53 }
 0x61a   : > { %v1628_v8 = vpack.c.bf16 %v1613_v19, %v1612_v63 }
 0x61c   : > { %v2080_v10 = vpop.f32.mrb[40].mxu1  ;;  %2091 = vmatpush3.bf16.msra.mxu0 %v1628_v8 }
 0x61d   : > { %v1618_v41 = vmul.f32 %v2080_v10, %v2854_v21  ;;  %v1565_v18 = vpop.f32.mrb[41].mxu1  ;;  %2092 = vmatprep.subr.bf16.mxu0 %v2446_v0 }
 0x61e   : > { %v1616_v4 = vmul.f32 %v1565_v18, %v2835_v14  ;;  %v2081_v49 = vpop.f32.mrb[42].mxu1 }
 0x61f   : > { %v1619_v57 = vmul.f32 %v2081_v49, %v2857_v24  ;;  %v1568_v58 = vpop.f32.mrb[43].mxu1 }
 0x620   : > { %v1617_v7 = vmul.f32 %v1568_v58, %v2844_v17  ;;  %2093 = vmatpush3.bf16.msra.mxu0 %v1629_v1 }
 0x621   : > { %v1631_v29 = vpack.c.bf16 %v1619_v57, %v1618_v41  ;;  %2094 = vmatprep.subr.bf16.mxu0 %v2446_v0 }
 0x622   : > { %v1630_v60 = vpack.c.bf16 %v1617_v7, %v1616_v4 }
 0x624   : > { %v2084_v47 = vpop.f32.mrb[44].mxu1  ;;  %2095 = vmatpush3.bf16.msra.mxu0 %v1630_v60 }
 0x625   : > { %v1622_v21 = vmul.f32 %v2084_v47, %v2876_v36  ;;  %v1581_v55 = vpop.f32.mrb[45].mxu1  ;;  %2096 = vmatprep.subr.bf16.mxu0 %v2446_v0 }
 0x626   : > { %v1620_v14 = vmul.f32 %v1581_v55, %v2862_v27  ;;  %v2085_v50 = vpop.f32.mrb[46].mxu1 }
 0x627   : > { %v1623_v24 = vmul.f32 %v2085_v50, %v2879_v42  ;;  %v1584_v56 = vpop.f32.mrb[47].mxu1 }
 0x628   : > { %v1621_v17 = vmul.f32 %v1584_v56, %v2870_v31  ;;  %2097 = vmatpush3.bf16.msra.mxu0 %v1631_v29 }
 0x629   : > { %v1633_v39 = vpack.c.bf16 %v1623_v24, %v1622_v21  ;;  %2098 = vmatprep.subr.bf16.mxu0 %v2446_v0 }
 0x62a   : > { %v1632_v61 = vpack.c.bf16 %v1621_v17, %v1620_v14 }
 0x62c   : > { %v2088_v23 = vpop.f32.mrb[48].mxu1  ;;  %2099 = vmatpush3.bf16.msra.mxu0 %v1632_v61 }
 0x62d   : > { %v1626_v36 = vmul.f32 %v2088_v23, %v2890_v51  ;;  %v1597_v16 = vpop.f32.mrb[49].mxu1  ;;  %2100 = vmatprep.subr.bf16.mxu0 %v2446_v0 }
 0x62e   : > { %v1624_v27 = vmul.f32 %v1597_v16, %v2882_v45  ;;  %v2089_v42 = vpop.f32.mrb[50].mxu1 }
 0x62f   : > { %v1627_v32 = vmul.f32 %v2089_v42, %v2893_v59  ;;  %v1600_v31 = vpop.f32.mrb[51].mxu1 }
 0x630   : > { %v1625_v33 = vmul.f32 %v1600_v31, %v2887_v48  ;;  %2101 = vmatpush3.bf16.msra.mxu0 %v1633_v39 }
 0x631   : > { %v1635_v26 = vpack.c.bf16 %v1627_v32, %v1626_v36  ;;  %2102 = vmatprep.subr.bf16.mxu0 %v2446_v0 }
 0x632   : > { %v1634_v12 = vpack.c.bf16 %v1625_v33, %v1624_v27 }
 0x634   : > { %2103 = vmatpush3.bf16.msra.mxu0 %v1634_v12 }
 0x635   : > { %2104 = vmatprep.subr.bf16.mxu0 %v2446_v0 }
 0x638   : > { %2105 = vmatpush3.bf16.msra.mxu0 %v1635_v26 }
 0x63b   : > { %2107 = vmatmul.mubr.bf16.vlgmr.msra.gmra.mrb[52].mxu0 %v3052_v30 }
 0x70e   : > { %v1670_v45 = vpop.f32.mrb[52].mxu0 }
 0x70f   : > { %1677 = vst [vmem:[%s422_s23] sm:$0xff] %v1670_v45  ;;  %v2108_v0 = vpop.f32.mrb[53].mxu0 }
 0x710   : > { %v1673_v48 = vpop.f32.mrb[54].mxu0 }
 0x711   : > { %1678 = vst [vmem:[%s422_s23 + $0x8] sm:$0xff] %v1673_v48  ;;  %v2109_v51 = vpop.f32.mrb[55].mxu0 }
 0x712   : > { %2380 = shalt.err (!%p2377_p13)
}
 0x713   : > { %s2381_s13 = scalar_lea.hbm %s3130_s28, 256  ;;  %s2385_s19 = scalar_lea.hbm %s3184_s10, 512 }
 0x714   : > { %p2382_p6 = scmp.ne.s32.totalorder %s3130_s28, %s2381_s13  ;;  %p2386_p7 = scmp.lt.u32.totalorder %s3130_s28, %s3184_s10 }
 0x715   : > { %p2387_p8 = scmp.lt.u32.totalorder %s2385_s19, %s2381_s13  ;;  %p2389_p0 = scmp.lt.u32.totalorder %s2381_s13, %s3130_s28 }
 0x716   : > { %p2383_p10 = pnand %p2382_p6, %p3206_p2 }
 0x717   : > { %p2388_p11 = por %p2387_p8, %p2386_p7 }
 0x718   : > { %p2384_p4 = pneg %p2383_p10 }
 0x719   : > { %p2390_p3 = por %p2389_p0, %p2388_p11 }
 0x71b   : > { %p2391_p5 = pnand %p2390_p3, %p2384_p4 }
 0x71d   : > { %2394 = shalt.err (!%p2391_p5)
}
 0x71e   : > { %s2450_s12 = smov 128   ;;  %s2451_s17 = smov 8  }
 0x71f   : > { %2121 = dma.vmem_to_hbm [thread:$0]  (%p3206_p2), %s3125_s26, 256, %s3130_s28, %s1680_s11, %s2450_s12, %s2450_s12, %s2451_s17  }
 0x720 PF: > { %s3207_s20 = sld [smem:[#allocation12_spill]]  ;;  %s3208_s27 = sld [smem:[#allocation13_spill]] }
 0x721   : > { %p3210_p12 = scmp.ge.s32.totalorder %s2437_s16, 2 }
 0x726   : > { %s1708_s24 = sand.u32 1, %s3207_s20   ;;  %p3209_p9 = scmp.ne.s32.totalorder %s3208_s27, 0 }
 0x727   : > { %s1709_s13 = scalar_lea.sflag [#allocation4], %s1708_s24 }
 0x728   : > { %p2135_p1 = pnand %p3210_p12, %p3209_p9 }
 0x72a   : > { %2420 = dma.done.wait (!%p2135_p1), %s1709_s13, 256  }
 0x72b   : > { %2422 = vsyncadd (!%p2135_p1), %s1709_s13, 4294967040  ;;  %p24_p13 = scmp.ge.s32.totalorder %s2620_s30, 4   ;;  %s3211_s13 = smov %s2429_s14 }
 0x72c   : > { %s3212_s14 = smov %s2433_s15  ;;  %s3213_s15 = smov %s2629_s18 }
 0x72d   : > { %s3214_s16 = smov %s2620_s30  ;;  %26 = sbr.rel (!%p24_p13) target bundleno = 6 (0x6), region = 116 }
 0x734   :  { %1714 = vsyncpa [#allocation3], 1 }
 0x735   :  { %1716 = vsyncpa [#allocation3 + $0x1], 1 }
 0x736   :  { %1717 = vsyncpa [#allocation6], 1 }
 0x737   :  { %1718 = vsyncpa [#allocation4], 1 }
 0x738   :  { %1720 = vsyncpa [#allocation4 + $0x1], 1 }

</bundles_post_ra>
